<compile_context>
chip_gen: v6e
topology: v6e:2x2x1
jax: 0.10.0
libtpu: 0.0.40
codegen_flags: <defaults>
</compile_context>

<pallas_src>
import jax
import jax.numpy as jnp
from jax.experimental import pallas as pl
from jax.experimental.pallas import tpu as pltpu

_BN_EPS = 1e-5


# ----------------------------------------------------------------------------
# helpers: padding / tile selection / hardware config
# ----------------------------------------------------------------------------
def _round_up(x, m):
    return ((x + m - 1) // m) * m


def _pad2d(x, rows, cols):
    r, c = x.shape
    return jnp.pad(x, ((0, rows - r), (0, cols - c)))


def _pick_tile(padded_dim, desired):
    """Largest multiple of 128 that divides `padded_dim` and is <= desired."""
    best = 128
    t = 128
    while t <= min(desired, padded_dim):
        if padded_dim % t == 0:
            best = t
        t += 128
    return best


def _hw_config():
    """(tm_des, tn_des, tk_des, vmem_limit_bytes) per TPU generation."""
    try:
        kind = jax.devices()[0].device_kind.lower()
    except Exception:  # pragma: no cover - defensive
        kind = ""
    if "v5 lite" in kind or "v5e" in kind:
        # v5e: lowest HBM BW, the A stream dominates -> 512 row tiles,
        # 128 MiB physical VMEM so a 64 MiB scoped limit is safe.
        return 512, 256, 512, 64 * 1024 * 1024
    if "v6" in kind:
        # v6e: 128 MiB physical VMEM -> big row tiles + raised scoped limit.
        return 1024, 256, 512, 96 * 1024 * 1024
    if "v7" in kind:
        # v7x: 64 MiB physical VMEM per TC; 512 tiles + 48 MiB budget.
        return 512, 256, 512, 48 * 1024 * 1024
    # unknown / older generations: keep the compiler's default VMEM limit.
    return 512, 256, 512, None


def _compiler_params(dim_sem, vmem_limit):
    if vmem_limit is None:
        return pltpu.CompilerParams(dimension_semantics=dim_sem)
    return pltpu.CompilerParams(dimension_semantics=dim_sem,
                                vmem_limit_bytes=vmem_limit)


def _pad_nodes(n, tm_des):
    """Pad N so the row tile never collapses below min(tm_des, n_pad)."""
    if n <= 128:
        return 128
    if n <= tm_des:
        return _round_up(n, 128)
    return _round_up(n, tm_des)


def _xw_resident_max_bytes(vmem_limit):
    # Resident XW is still double-buffered by the pipeline, so cap its block
    # at ~1/4 of the scoped budget (<= 1/2 of VMEM including both buffers).
    # TODO(synk): use pipeline_mode=pl.Buffered(1) for the invariant block to
    #             drop the second buffer once that path is validated.
    if vmem_limit is None:
        return 4 * 1024 * 1024
    return vmem_limit // 4


# ----------------------------------------------------------------------------
# Pallas kernels
# ----------------------------------------------------------------------------
def _xw_kernel(x_ref, w_ref, dinv_ref, o_ref, acc_ref):
    """o = (X @ W) * d_inv_sqrt[rows]  (bf16 operands, f32 accumulation)."""
    k = pl.program_id(2)

    @pl.when(k == 0)
    def _():
        acc_ref[...] = jnp.zeros_like(acc_ref)

    acc_ref[...] += jnp.dot(x_ref[...], w_ref[...],
                            preferred_element_type=jnp.float32)

    @pl.when(k == pl.num_programs(2) - 1)
    def _():
        o_ref[...] = (acc_ref[...] * dinv_ref[...]).astype(o_ref.dtype)


def _make_agg_kernel(tk, resident):
    """o = d_inv_sqrt[rows] * ((A+I) @ XW) + b.

    If `resident`, xw_ref holds the whole (N, d) operand pinned in VMEM and
    the kernel slices the k-th (tk, d) chunk; otherwise xw_ref is the
    (tk, tn) streamed block.
    """
    def kernel(a_ref, xw_ref, dinv_ref, b_ref, o_ref, acc_ref):
        k = pl.program_id(2)

        @pl.when(k == 0)
        def _():
            acc_ref[...] = jnp.zeros_like(acc_ref)

        if resident:
            off = pl.multiple_of(k * tk, tk)
            xw_blk = xw_ref[pl.ds(off, tk), :]
        else:
            xw_blk = xw_ref[...]
        acc_ref[...] += jnp.dot(a_ref[...], xw_blk,
                                preferred_element_type=jnp.float32)

        @pl.when(k == pl.num_programs(2) - 1)
        def _():
            o_ref[...] = (acc_ref[...] * dinv_ref[...]
                          + b_ref[...]).astype(o_ref.dtype)

    return kernel


def _make_agg_head_kernel(tk, resident):
    """Last GCN layer + fused projection head.

    encoder_norm (eval BN) is pre-folded into the last layer's W/b and the
    projection head's BN into wp/bp, so the epilogue is d_inv_sqrt row scale
    -> bias add -> d x d matmul -> bias add -> ReLU (Dropout = identity).
    """
    def kernel(a_ref, xw_ref, dinv_ref, b_ref, wp_ref, bp_ref,
               xnorm_ref, proj_ref, acc_ref):
        k = pl.program_id(1)

        @pl.when(k == 0)
        def _():
            acc_ref[...] = jnp.zeros_like(acc_ref)

        if resident:
            off = pl.multiple_of(k * tk, tk)
            xw_blk = xw_ref[pl.ds(off, tk), :]
        else:
            xw_blk = xw_ref[...]
        acc_ref[...] += jnp.dot(a_ref[...], xw_blk,
                                preferred_element_type=jnp.float32)

        @pl.when(k == pl.num_programs(1) - 1)
        def _():
            xn = acc_ref[...] * dinv_ref[...] + b_ref[...]
            xnorm_ref[...] = xn.astype(xnorm_ref.dtype)
            h = jnp.dot(xn.astype(jnp.bfloat16), wp_ref[...],
                        preferred_element_type=jnp.float32) + bp_ref[...]
            proj_ref[...] = jnp.maximum(h, 0.0).astype(proj_ref.dtype)

    return kernel


# ----------------------------------------------------------------------------
# pallas_call wrappers
# ----------------------------------------------------------------------------
def matmul_xw(x, w, dinv, *, tm, tn, tk, vmem_limit, out_dtype=jnp.bfloat16):
    m, kdim = x.shape
    n = w.shape[1]
    grid = (m // tm, n // tn, kdim // tk)
    return pl.pallas_call(
        _xw_kernel,
        out_shape=jax.ShapeDtypeStruct((m, n), out_dtype),
        grid=grid,
        in_specs=[
            pl.BlockSpec((tm, tk), lambda i, j, k: (i, k)),
            pl.BlockSpec((tk, tn), lambda i, j, k: (k, j)),
            pl.BlockSpec((tm, 1), lambda i, j, k: (i, 0)),
        ],
        out_specs=pl.BlockSpec((tm, tn), lambda i, j, k: (i, j)),
        scratch_shapes=[pltpu.VMEM((tm, tn), jnp.float32)],
        compiler_params=_compiler_params(
            ("parallel", "parallel", "arbitrary"), vmem_limit),
    )(x, w, dinv)


def aggregate(a, xw, dinv, b, *, tm, tn, tk, vmem_limit,
              out_dtype=jnp.bfloat16):
    m, kdim = a.shape
    n = xw.shape[1]
    resident = kdim * tn * xw.dtype.itemsize <= _xw_resident_max_bytes(vmem_limit)
    if resident:
        xw_spec = pl.BlockSpec((kdim, tn), lambda i, j, k: (0, j))
    else:
        xw_spec = pl.BlockSpec((tk, tn), lambda i, j, k: (k, j))
    grid = (m // tm, n // tn, kdim // tk)
    return pl.pallas_call(
        _make_agg_kernel(tk, resident),
        out_shape=jax.ShapeDtypeStruct((m, n), out_dtype),
        grid=grid,
        in_specs=[
            pl.BlockSpec((tm, tk), lambda i, j, k: (i, k)),
            xw_spec,
            pl.BlockSpec((tm, 1), lambda i, j, k: (i, 0)),
            pl.BlockSpec((1, tn), lambda i, j, k: (0, j)),
        ],
        out_specs=pl.BlockSpec((tm, tn), lambda i, j, k: (i, j)),
        scratch_shapes=[pltpu.VMEM((tm, tn), jnp.float32)],
        compiler_params=_compiler_params(
            ("parallel", "parallel", "arbitrary"), vmem_limit),
    )(a, xw, dinv, b)


def aggregate_head(a, xw, dinv, b, wp, bp, *, tm, tk, vmem_limit):
    m, kdim = a.shape
    d = xw.shape[1]  # padded rep dim kept whole so the head can fuse
    resident = kdim * d * xw.dtype.itemsize <= _xw_resident_max_bytes(vmem_limit)
    if resident:
        xw_spec = pl.BlockSpec((kdim, d), lambda i, k: (0, 0))
    else:
        xw_spec = pl.BlockSpec((tk, d), lambda i, k: (k, 0))
    grid = (m // tm, kdim // tk)
    return pl.pallas_call(
        _make_agg_head_kernel(tk, resident),
        out_shape=(jax.ShapeDtypeStruct((m, d), jnp.float32),
                   jax.ShapeDtypeStruct((m, d), jnp.float32)),
        grid=grid,
        in_specs=[
            pl.BlockSpec((tm, tk), lambda i, k: (i, k)),
            xw_spec,
            pl.BlockSpec((tm, 1), lambda i, k: (i, 0)),
            pl.BlockSpec((1, d), lambda i, k: (0, 0)),
            pl.BlockSpec((d, d), lambda i, k: (0, 0)),
            pl.BlockSpec((1, d), lambda i, k: (0, 0)),
        ],
        out_specs=(
            pl.BlockSpec((tm, d), lambda i, k: (i, 0)),
            pl.BlockSpec((tm, d), lambda i, k: (i, 0)),
        ),
        scratch_shapes=[pltpu.VMEM((tm, d), jnp.float32)],
        compiler_params=_compiler_params(("parallel", "arbitrary"), vmem_limit),
    )(a, xw, dinv, b, wp, bp)


# ----------------------------------------------------------------------------
# Graph operands: padded bf16 (A + I) and f32 d_inv_sqrt column vector.
# The symmetric normalization is applied INSIDE the kernels (no extra N^2
# normalize / cast passes, and 0/1 edge weights stay exact in bf16).
# ----------------------------------------------------------------------------
def build_graph_operands(edge_index, edge_weight, num_nodes, n_pad):
    src, dst = edge_index[0], edge_index[1]
    if edge_weight is None:
        edge_weight = jnp.ones((edge_index.shape[1],), jnp.float32)
    edge_weight = edge_weight.astype(jnp.float32)

    a = jnp.zeros((n_pad, n_pad), jnp.bfloat16)
    a = a.at[dst, src].add(edge_weight.astype(jnp.bfloat16))  # A[dst, src] = w
    diag = jnp.arange(num_nodes, dtype=jnp.int32)
    a = a.at[diag, diag].add(jnp.bfloat16(1.0))                # self loops

    # deg = rowsum(A + I), computed O(E) without touching the dense matrix.
    deg = jnp.ones((num_nodes,), jnp.float32).at[dst].add(edge_weight)
    dinv = jnp.where(deg > 0, jax.lax.rsqrt(deg), 0.0)
    dinv_pad = _pad2d(dinv.reshape(-1, 1), n_pad, 1)           # (n_pad, 1) f32
    return a, dinv_pad
    # TODO(synk): for large sparse graphs replace the dense O(N^2) (A + I)
    #             with a CSR gather kernel using PrefetchScalarGridSpec.


# ----------------------------------------------------------------------------
# Encoder (eval mode), deterministic parameter init
# ----------------------------------------------------------------------------
class Encoder:
    def __init__(self, layer_config, gnn_type="gcn", dropout=0.5, key=None):
        assert gnn_type == "gcn", "only 'gcn' is implemented in this kernel"
        # TODO(synk): 'sage'/'gat' variants (neighbor-mean / attention) not ported.
        self.gnn_type = gnn_type
        self.dropout = dropout
        self.rep_dim = layer_config[-1]
        self.layer_config = list(layer_config)
        key = jax.random.PRNGKey(0) if key is None else key

        # raw parameters (also used by the pure-JAX f32 reference)
        self.gnn_weights = []
        self.gnn_biases = []
        for i in range(1, len(layer_config)):
            key, kw = jax.random.split(key)
            f_in, f_out = layer_config[i - 1], layer_config[i]
            self.gnn_weights.append(
                0.1 * jax.random.normal(kw, (f_in, f_out), jnp.float32))
            self.gnn_biases.append(jnp.zeros((f_out,), jnp.float32))

        # BatchNorm1d params packed rows: [gamma, beta, running_mean, running_var]
        def bn_params(d_):
            return jnp.stack([
                jnp.ones((d_,), jnp.float32),
                jnp.zeros((d_,), jnp.float32),
                jnp.zeros((d_,), jnp.float32),
                jnp.ones((d_,), jnp.float32),
            ])

        self.encoder_norm = bn_params(self.rep_dim)

        key, kp, kb = jax.random.split(key, 3)
        # nn.Linear(rep_dim, rep_dim): y = x @ W^T + b; stored pre-transposed.
        self.proj_w = 0.1 * jax.random.normal(
            kp, (self.rep_dim, self.rep_dim), jnp.float32)
        self.proj_b = 0.1 * jax.random.normal(kb, (self.rep_dim,), jnp.float32)
        self.proj_norm = bn_params(self.rep_dim)

        # per-generation tile / VMEM configuration, resolved once
        self._tm_des, self._tn_des, self._tk_des, self._vmem = _hw_config()

        # fold eval BatchNorms, pad and cast everything once (not per forward)
        self._prepare_packed_params()

    @staticmethod
    def _bn_scale_shift(bn):
        g, b, m, v = bn[0], bn[1], bn[2], bn[3]
        scale = g * jax.lax.rsqrt(v + _BN_EPS)
        return scale, b - m * scale

    def _prepare_packed_params(self):
        tn_des, tk_des = self._tn_des, self._tk_des

        # intermediate layers
        self._packed_layers = []
        for li in range(len(self.gnn_weights) - 1):
            w, b = self.gnn_weights[li], self.gnn_biases[li]
            f_in, f_out = w.shape
            f_in_pad, f_out_pad = _round_up(f_in, 128), _round_up(f_out, 128)
            w_p = _pad2d(w, f_in_pad, f_out_pad).astype(jnp.bfloat16)
            b_p = _pad2d(b.reshape(1, -1), 1, f_out_pad)
            tn = f_out_pad if f_out_pad <= 512 else _pick_tile(f_out_pad, tn_des)
            tkf = _pick_tile(f_in_pad, tk_des)
            self._packed_layers.append((w_p, b_p, tn, tkf))

        # last layer: encoder_norm (eval BN) folded into W/b
        s1, sh1 = self._bn_scale_shift(self.encoder_norm)
        w_last = self.gnn_weights[-1] * s1[None, :]
        b_last = self.gnn_biases[-1] * s1 + sh1
        f_in, d = w_last.shape
        f_in_pad = _round_up(f_in, 128)
        d_pad = _round_up(d, 128)
        self._d_pad = d_pad
        self._w_last = _pad2d(w_last, f_in_pad, d_pad).astype(jnp.bfloat16)
        self._b_last = _pad2d(b_last.reshape(1, -1), 1, d_pad)
        self._tk_last = _pick_tile(f_in_pad, tk_des)
        self._tn_last = d_pad if d_pad <= 512 else _pick_tile(d_pad, tn_des)

        # projection head: its BN folded into Wp/bp
        s2, sh2 = self._bn_scale_shift(self.proj_norm)
        wp = self.proj_w * s2[None, :]
        bp = self.proj_b * s2 + sh2
        self._wp = _pad2d(wp, d_pad, d_pad).astype(jnp.bfloat16)
        self._bp = _pad2d(bp.reshape(1, -1), 1, d_pad)

        self._f0_pad = _round_up(self.layer_config[0], 128)

    # -- graph preprocessing (hoist out of the per-forward path) -------------
    def n_pad_for(self, num_nodes):
        return _pad_nodes(num_nodes, self._tm_des)

    def precompute_graph(self, edge_index, edge_weight, num_nodes):
        n_pad = self.n_pad_for(num_nodes)
        return build_graph_operands(edge_index, edge_weight, num_nodes, n_pad)

    # -- forward --------------------------------------------------------------
    def __call__(self, x, edge_index, edge_weight=None, graph=None):
        n = x.shape[0]
        d = self.rep_dim
        if graph is None:
            graph = self.precompute_graph(edge_index, edge_weight, n)
        a_pad, dinv_pad = graph
        n_pad = a_pad.shape[0]

        tm = _pick_tile(n_pad, self._tm_des)    # row tile of A / outputs
        tk_n = _pick_tile(n_pad, self._tk_des)  # reduction tile over N
        vmem = self._vmem

        # input features: pad to lane-dense shape, cast to bf16
        h = _pad2d(x.astype(jnp.float32), n_pad, self._f0_pad).astype(jnp.bfloat16)

        # intermediate GCN layers (dropout = identity in eval mode)
        for (w_p, b_p, tn, tkf) in self._packed_layers:
            xw = matmul_xw(h, w_p, dinv_pad,
                           tm=tm, tn=tn, tk=tkf, vmem_limit=vmem)
            h = aggregate(a_pad, xw, dinv_pad, b_p,
                          tm=tm, tn=tn, tk=tk_n, vmem_limit=vmem)

        # last GCN layer (encoder_norm folded in) + fused projection head
        xw = matmul_xw(h, self._w_last, dinv_pad,
                       tm=tm, tn=self._tn_last, tk=self._tk_last,
                       vmem_limit=vmem)
        x_norm_pad, proj_pad = aggregate_head(
            a_pad, xw, dinv_pad, self._b_last, self._wp, self._bp,
            tm=tm, tk=tk_n, vmem_limit=vmem)

        return x_norm_pad[:n, :d], proj_pad[:n, :d]


# ----------------------------------------------------------------------------
# Pure-JAX reference (f32, eval-mode semantics) for a numerical sanity check
# ----------------------------------------------------------------------------
def _gcn_norm_dense_ref(edge_index, edge_weight, num_nodes):
    src, dst = edge_index[0], edge_index[1]
    if edge_weight is None:
        edge_weight = jnp.ones((edge_index.shape[1],), jnp.float32)
    a = jnp.zeros((num_nodes, num_nodes), jnp.float32)
    a = a.at[dst, src].add(edge_weight)
    a = a + jnp.eye(num_nodes, dtype=jnp.float32)
    deg = a.sum(axis=1)
    dinv = jnp.where(deg > 0, jax.lax.rsqrt(deg), 0.0)
    return dinv[:, None] * a * dinv[None, :]


def _reference_forward(model, x, a_norm):
    h = x.astype(jnp.float32)
    for w, b in zip(model.gnn_weights, model.gnn_biases):
        h = a_norm @ (h @ w) + b

    def bn(t, p):
        g, be, m, v = p
        return (t - m) * (g / jnp.sqrt(v + _BN_EPS)) + be

    xn = bn(h, model.encoder_norm)
    pr = jnp.maximum(bn(xn @ model.proj_w + model.proj_b, model.proj_norm), 0.0)
    return xn, pr


# ----------------------------------------------------------------------------
# main
# ----------------------------------------------------------------------------
if __name__ == "__main__":
    key = jax.random.PRNGKey(0)

    num_nodes = 16
    in_dim, hid_dim, rep_dim = 8, 32, 32
    layer_config = [in_dim, hid_dim, rep_dim]

    key, kx = jax.random.split(key)
    x = jax.random.normal(kx, (num_nodes, in_dim), jnp.float32)

    # simple bidirectional ring graph: 2 * num_nodes directed edges
    src = jnp.arange(num_nodes, dtype=jnp.int32)
    dst = (src + 1) % num_nodes
    edge_index = jnp.concatenate(
        [jnp.stack([src, dst]), jnp.stack([dst, src])], axis=1)  # [2, 32]
    edge_weight = jnp.ones((edge_index.shape[1],), jnp.float32)

    model = Encoder(layer_config, gnn_type="gcn", dropout=0.5,
                    key=jax.random.PRNGKey(42))

    # graph preprocessing hoisted out of the forward path (reusable)
    graph = model.precompute_graph(edge_index, edge_weight, num_nodes)

    x_out, proj_out = model(x, edge_index, edge_weight, graph=graph)
    jax.block_until_ready((x_out, proj_out))

    assert x_out.shape == (num_nodes, rep_dim)
    assert proj_out.shape == (num_nodes, rep_dim)
    assert bool(jnp.all(proj_out >= 0.0))  # ReLU output

    # numerical check against the f32 dense reference (bf16 matmul tolerance)
    a_ref = _gcn_norm_dense_ref(edge_index, edge_weight, num_nodes)
    x_ref, p_ref = _reference_forward(model, x, a_ref)
    err_x = float(jnp.max(jnp.abs(x_out - x_ref)))
    err_p = float(jnp.max(jnp.abs(proj_out - p_ref)))
    assert err_x < 5e-2 and err_p < 5e-2, (err_x, err_p)

    print("KERNEL_OK")
</pallas_src>

<mosaic_0001>
module attributes {stable_mosaic.version = 11 : i64} {
  func.func @_xw_kernel(%arg0: i32, %arg1: i32, %arg2: i32, %arg3: memref<128x128xbf16, #tpu.memory_space<vmem>>, %arg4: memref<128x128xbf16, #tpu.memory_space<vmem>>, %arg5: memref<128x1xf32, #tpu.memory_space<vmem>>, %arg6: memref<128x128xbf16, #tpu.memory_space<vmem>>, %arg7: memref<128x128xf32, #tpu.memory_space<vmem>>) attributes {dimension_semantics = [#tpu.dimension_semantics<parallel>, #tpu.dimension_semantics<parallel>, #tpu.dimension_semantics<arbitrary>], iteration_bounds = array<i64: 1, 1, 1>, scalar_prefetch = 0 : i64, scratch_operands = 1 : i64, tpu.core_type = #tpu.core_type<tc>, window_params = [{transform_indices = @transform_0, window_bounds = array<i64: 128, 128>}, {transform_indices = @transform_1, window_bounds = array<i64: 128, 128>}, {transform_indices = @transform_2, window_bounds = array<i64: 128, 1>}, {transform_indices = @transform_3, window_bounds = array<i64: 128, 128>}]} {
    %c0_i32 = arith.constant 0 : i32
    %0 = arith.cmpi eq, %arg2, %c0_i32 : i32
    %1 = arith.extui %0 : i1 to i32
    %c0_i32_0 = arith.constant 0 : i32
    %2 = arith.cmpi ne, %1, %c0_i32_0 : i32
    scf.if %2 {
      %cst_10 = arith.constant 0.000000e+00 : f32
      %12 = vector.broadcast %cst_10 : f32 to vector<128x128xf32>
      %c0_11 = arith.constant 0 : index
      %c0_12 = arith.constant 0 : index
      %13 = vector.load %arg7[%c0_11, %c0_12] : memref<128x128xf32, #tpu.memory_space<vmem>>, vector<128x128xf32>
      tpu.vector_store %arg7[%c0_11, %c0_12], %12 {strides = array<i32>} : memref<128x128xf32, #tpu.memory_space<vmem>>, vector<128x128xf32>,
    } else {
    }
    %c0 = arith.constant 0 : index
    %c0_1 = arith.constant 0 : index
    %3 = vector.load %arg7[%c0, %c0_1] : memref<128x128xf32, #tpu.memory_space<vmem>>, vector<128x128xf32>
    %c0_2 = arith.constant 0 : index
    %c0_3 = arith.constant 0 : index
    %4 = vector.load %arg3[%c0_2, %c0_3] : memref<128x128xbf16, #tpu.memory_space<vmem>>, vector<128x128xbf16>
    %c0_4 = arith.constant 0 : index
    %c0_5 = arith.constant 0 : index
    %5 = vector.load %arg4[%c0_4, %c0_5] : memref<128x128xbf16, #tpu.memory_space<vmem>>, vector<128x128xbf16>
    %cst = arith.constant dense<0.000000e+00> : vector<128x128xf32>
    %6 = tpu.matmul %4, %5, %cst {dimension_numbers = #tpu.dot_dimension_numbers<[1], [0], [0], [1], [0, 0, 1, 1], [], []>} : vector<128x128xbf16>, vector<128x128xbf16>, vector<128x128xf32> -> vector<128x128xf32>
    %7 = arith.addf %3, %6 : vector<128x128xf32>
    %c0_6 = arith.constant 0 : index
    %c0_7 = arith.constant 0 : index
    %8 = vector.load %arg7[%c0_6, %c0_7] : memref<128x128xf32, #tpu.memory_space<vmem>>, vector<128x128xf32>
    tpu.vector_store %arg7[%c0_6, %c0_7], %7 {strides = array<i32>} : memref<128x128xf32, #tpu.memory_space<vmem>>, vector<128x128xf32>,
    %c0_i32_8 = arith.constant 0 : i32
    %9 = arith.cmpi eq, %arg2, %c0_i32_8 : i32
    %10 = arith.extui %9 : i1 to i32
    %c0_i32_9 = arith.constant 0 : i32
    %11 = arith.cmpi ne, %10, %c0_i32_9 : i32
    scf.if %11 {
      %c0_10 = arith.constant 0 : index
      %c0_11 = arith.constant 0 : index
      %12 = vector.load %arg7[%c0_10, %c0_11] : memref<128x128xf32, #tpu.memory_space<vmem>>, vector<128x128xf32>
      %c0_12 = arith.constant 0 : index
      %c0_13 = arith.constant 0 : index
      %13 = vector.load %arg5[%c0_12, %c0_13] : memref<128x1xf32, #tpu.memory_space<vmem>>, vector<128x1xf32>
      %14 = vector.broadcast %13 : vector<128x1xf32> to vector<128x128xf32>
      %15 = arith.mulf %12, %14 : vector<128x128xf32>
      %16 = arith.truncf %15 : vector<128x128xf32> to vector<128x128xbf16>
      %c0_14 = arith.constant 0 : index
      %c0_15 = arith.constant 0 : index
      %17 = vector.load %arg6[%c0_14, %c0_15] : memref<128x128xbf16, #tpu.memory_space<vmem>>, vector<128x128xbf16>
      tpu.vector_store %arg6[%c0_14, %c0_15], %16 {strides = array<i32>} : memref<128x128xbf16, #tpu.memory_space<vmem>>, vector<128x128xbf16>,
    } else {
    }
    return
  }
  func.func @transform_0(%arg0: i32, %arg1: i32, %arg2: i32) -> (i32, i32) {
    %c0_i32 = arith.constant 0 : i32
    return %arg0, %arg2 : i32, i32
  }
  func.func @transform_1(%arg0: i32, %arg1: i32, %arg2: i32) -> (i32, i32) {
    %c0_i32 = arith.constant 0 : i32
    return %arg2, %arg1 : i32, i32
  }
  func.func @transform_2(%arg0: i32, %arg1: i32, %arg2: i32) -> (i32, i32) {
    %c0_i32 = arith.constant 0 : i32
    %c0_i32_0 = arith.constant 0 : i32
    return %arg0, %c0_i32 : i32, i32
  }
  func.func @transform_3(%arg0: i32, %arg1: i32, %arg2: i32) -> (i32, i32) {
    %c0_i32 = arith.constant 0 : i32
    return %arg0, %arg1 : i32, i32
  }
}

</mosaic_0001>

<bundles_post_ra>
// kernel: tpu_custom_call.1
= control target key start
LH: loop header
LB: loop body
LE: loop exit
PB: predicated region body
PF: predicated region fallthrough
CT: control target
= control target key end

     0   :  { %v739_v2 = vmov 0   ;;  %s862_s0 = inlined_call_operand.vmem [shape: bf16[128,128], index: 0, kind: input, shape index: {}]   ;;  %s863_s1 = inlined_call_operand.vmem [shape: bf16[128,128], index: 1, kind: input, shape index: {}]   ;;  %s864_s2 = inlined_call_operand.vmem [shape: f32[128,1], index: 2, kind: input, shape index: {}]   ;;  %s865_s3 = inlined_call_operand.hbm [shape: bf16[128,128], index: 3, kind: output, shape index: {}]  }
   0x1   :  { %v701_v0 = vld [vmem:[%s863_s1 + $0x38] sm:$0xff]   ;;  %v702_v1 = vld [vmem:[%s863_s1 + $0x30] sm:$0xff]   ;;  %700 = vset.pattern.permute.xlu1 %v739_v2  ;;  %699 = vset.pattern.permute.xlu0 %v739_v2  ;;  %v703_v3 = vld [vmem:[%s863_s1 + $0x28] sm:$0xff]  }
   0x2   :  { %647 = vmatprep.subr.bf16.mxu0 %v701_v0  ;;  %679 = vmatprep.subr.bf16.mxu1 %v701_v0  ;;  %v704_v4 = vld [vmem:[%s863_s1 + $0x20] sm:$0xff]   ;;  %v705_v7 = vld [vmem:[%s863_s1 + $0x18] sm:$0xff]   ;;  %v706_v8 = vld [vmem:[%s863_s1 + $0x10] sm:$0xff]  }
   0x3   :  { %648 = vmatpush3.bf16.msra.mxu0 %v701_v0  ;;  %687 = vmatpush3.bf16.msra.mxu1 %v701_v0  ;;  %v709_v5 = vld [vmem:[%s862_s0] sm:$0xff]   ;;  %v330_v9 = vld [vmem:[%s864_s2 + $0x10] sm:$0xff]  ;;  %v331_v11 = vld [vmem:[%s864_s2 + $0x18] sm:$0xff] }
   0x4   :  { %649 = vmatprep.subr.bf16.mxu0 %v702_v1  ;;  %680 = vmatprep.subr.bf16.mxu1 %v702_v1  ;;  %v710_v6 = vld [vmem:[%s862_s0 + $0x20] sm:$0xff]   ;;  %v329_v12 = vld [vmem:[%s864_s2 + $0x8] sm:$0xff] }
   0x5   :  { %663 = vmatprep.mubr.bf16.mxu0 %v709_v5  ;;  %671 = vmatprep.mubr.bf16.mxu1 %v710_v6  ;;  %v328_v10 = vld [vmem:[%s864_s2] sm:$0xff]  ;;  %v707_v13 = vld [vmem:[%s863_s1 + $0x8] sm:$0xff]  }
   0x6   :  { %356 = vperm.xlu1 %700, %v330_v9   ;;  %346 = vperm.xlu0 %699, %v328_v10  }
   0x7   :  { %650 = vmatpush3.bf16.msra.mxu0 %v702_v1  ;;  %688 = vmatpush3.bf16.msra.mxu1 %v702_v1 }
   0x8   :  { %651 = vmatprep.subr.bf16.mxu0 %v703_v3  ;;  %681 = vmatprep.subr.bf16.mxu1 %v703_v3 }
   0xa   :  { %361 = vperm.xlu1 %700, %v331_v11   ;;  %351 = vperm.xlu0 %699, %v329_v12  }
   0xb   :  { %652 = vmatpush3.bf16.msra.mxu0 %v703_v3  ;;  %689 = vmatpush3.bf16.msra.mxu1 %v703_v3 }
   0xc   :  { %653 = vmatprep.subr.bf16.mxu0 %v704_v4  ;;  %682 = vmatprep.subr.bf16.mxu1 %v704_v4 }
   0xf   :  { %654 = vmatpush3.bf16.msra.mxu0 %v704_v4  ;;  %690 = vmatpush3.bf16.msra.mxu1 %v704_v4 }
  0x10   :  { %655 = vmatprep.subr.bf16.mxu0 %v705_v7  ;;  %683 = vmatprep.subr.bf16.mxu1 %v705_v7 }
  0x13   :  { %656 = vmatpush3.bf16.msra.mxu0 %v705_v7  ;;  %691 = vmatpush3.bf16.msra.mxu1 %v705_v7 }
  0x14   :  { %657 = vmatprep.subr.bf16.mxu0 %v706_v8  ;;  %684 = vmatprep.subr.bf16.mxu1 %v706_v8 }
  0x15   :  { %8 = vsyncpa [#allocation4], 0  ;;  %v333_v14 = vld [vmem:[%s864_s2 + $0x28] sm:$0xff]  ;;  %v332_v15 = vld [vmem:[%s864_s2 + $0x20] sm:$0xff] }
  0x16   :  { %v708_v16 = vld [vmem:[%s863_s1] sm:$0xff]   ;;  %371 = vperm.xlu1 %700, %v333_v14   ;;  %366 = vperm.xlu0 %699, %v332_v15   ;;  %v335_v17 = vld [vmem:[%s864_s2 + $0x38] sm:$0xff]  ;;  %v334_v18 = vld [vmem:[%s864_s2 + $0x30] sm:$0xff] }
  0x17   :  { %658 = vmatpush3.bf16.msra.mxu0 %v706_v8  ;;  %692 = vmatpush3.bf16.msra.mxu1 %v706_v8  ;;  %v711_v19 = vld [vmem:[%s862_s0 + $0x8] sm:$0xff]   ;;  %v336_v22 = vld [vmem:[%s864_s2 + $0x40] sm:$0xff]  ;;  %v713_v23 = vld [vmem:[%s862_s0 + $0x10] sm:$0xff]  }
  0x18   :  { %659 = vmatprep.subr.bf16.mxu0 %v707_v13  ;;  %685 = vmatprep.subr.bf16.mxu1 %v707_v13  ;;  %v712_v20 = vld [vmem:[%s862_s0 + $0x28] sm:$0xff]   ;;  %v714_v24 = vld [vmem:[%s862_s0 + $0x30] sm:$0xff]   ;;  %v339_v25 = vld [vmem:[%s864_s2 + $0x58] sm:$0xff] }
  0x19   :  { %v337_v21 = vld [vmem:[%s864_s2 + $0x48] sm:$0xff]  ;;  %v338_v26 = vld [vmem:[%s864_s2 + $0x50] sm:$0xff]  ;;  %v715_v27 = vld [vmem:[%s862_s0 + $0x18] sm:$0xff]  }
  0x1a   :  { %381 = vperm.xlu1 %700, %v335_v17   ;;  %376 = vperm.xlu0 %699, %v334_v18   ;;  %v716_v28 = vld [vmem:[%s862_s0 + $0x38] sm:$0xff]   ;;  %v341_v29 = vld [vmem:[%s864_s2 + $0x68] sm:$0xff]  ;;  %v340_v30 = vld [vmem:[%s864_s2 + $0x60] sm:$0xff]  ;;  %s740_s0 = smov [#allocation3]  }
  0x1b   :  { %660 = vmatpush3.bf16.msra.mxu0 %v707_v13  ;;  %693 = vmatpush3.bf16.msra.mxu1 %v707_v13  ;;  %v343_v31 = vld [vmem:[%s864_s2 + $0x78] sm:$0xff]  ;;  %v342_v32 = vld [vmem:[%s864_s2 + $0x70] sm:$0xff]  ;;  %s525_s2 = sshll.u32 %s740_s0, 4  ;;  %s526_s2 = int_to_ptr.vmem [resolvable:$true] %s525_s2 }
  0x1c   :  { %661 = vmatprep.subr.bf16.mxu0 %v708_v16  ;;  %686 = vmatprep.subr.bf16.mxu1 %v708_v16  ;;  %s717_s21 = scalar_lea.vmem %s526_s2, 1024  ;;  %p722_p1 = scmp.lt.s32.totalorder %s526_s2, %s526_s2 }
  0x1d   :  { %p718_p0 = scmp.ne.s32.totalorder %s526_s2, %s717_s21  ;;  %p723_p2 = scmp.lt.s32.totalorder %s717_s21, %s717_s21 }
  0x1e   :  { %391 = vperm.xlu1 %700, %v337_v21   ;;  %386 = vperm.xlu0 %699, %v336_v22  }
  0x1f   :  { %662 = vmatpush3.bf16.msra.mxu0 %v708_v16  ;;  %694 = vmatpush3.bf16.msra.mxu1 %v708_v16  ;;  %p724_p3 = por %p723_p2, %p722_p1 }
  0x21   :  { %p725_p4 = pnand %p724_p3, %p718_p0 }
  0x22   :  { %664 = vmatmul.mubr.bf16.vlgmr.msra.gmra.mxu0 %v711_v19  ;;  %672 = vmatmul.mubr.bf16.vlgmr.msra.gmra.mxu1 %v712_v20 }
  0x23   :  { %667 = vmatprep.mubr.bf16.mxu0 %v713_v23  ;;  %675 = vmatprep.mubr.bf16.mxu1 %v714_v24 }
  0x24   :  { %401 = vperm.xlu1 %700, %v339_v25   ;;  %396 = vperm.xlu0 %699, %v338_v26  }
  0x28   :  { %411 = vperm.xlu1 %700, %v341_v29   ;;  %406 = vperm.xlu0 %699, %v340_v30  }
  0x2a   :  { %668 = vmatmul.mubr.bf16.gmra.mxu0 %v715_v27  ;;  %676 = vmatmul.mubr.bf16.gmra.mxu1 %v716_v28 }
  0x2c   :  { %421 = vperm.xlu1 %700, %v343_v31   ;;  %416 = vperm.xlu0 %699, %v342_v32  }
  0x81   :  { %v357_v33 = vpop.permute.xlu1 %356  ;;  %v347_v34 = vpop.permute.xlu0 %346 }
  0x85   :  { %v362_v35 = vpop.permute.xlu1 %361  ;;  %v352_v36 = vpop.permute.xlu0 %351 }
  0x91   :  { %v372_v37 = vpop.permute.xlu1 %371  ;;  %v367_v38 = vpop.permute.xlu0 %366 }
  0x95   :  { %v382_v39 = vpop.permute.xlu1 %381  ;;  %v377_v40 = vpop.permute.xlu0 %376 }
  0x99   :  { %v392_v41 = vpop.permute.xlu1 %391  ;;  %v387_v42 = vpop.permute.xlu0 %386 }
  0x9f   :  { %v402_v43 = vpop.permute.xlu1 %401  ;;  %v397_v44 = vpop.permute.xlu0 %396 }
  0xa3   :  { %v412_v51 = vpop.permute.xlu1 %411  ;;  %v407_v52 = vpop.permute.xlu0 %406 }
  0xa7   :  { %v422_v7 = vpop.permute.xlu1 %421  ;;  %v417_v8 = vpop.permute.xlu0 %416 }
  0xe2   :  { %v665_v45 = vpop.f32.mrf.mxu0  ;;  %v673_v46 = vpop.f32.mrf.mxu1 }
  0xe3   :  { %v426_v53 = vmul.f32 %v665_v45, %v357_v33  ;;  %v434_v54 = vmul.f32 %v673_v46, %v397_v44 }
  0xe4   :  { %v214_v47 = vpop.f32.mrf.mxu0  ;;  %v246_v48 = vpop.f32.mrf.mxu1 }
  0xe5   :  { %v424_v57 = vmul.f32 %v347_v34, %v214_v47  ;;  %v432_v58 = vmul.f32 %v387_v42, %v246_v48 }
  0xe6   :  { %v666_v49 = vpop.f32.mrf.mxu0  ;;  %v674_v50 = vpop.f32.mrf.mxu1 }
  0xe7   :  { %v427_v55 = vmul.f32 %v666_v49, %v362_v35  ;;  %v435_v56 = vmul.f32 %v674_v50, %v402_v43 }
  0xe8   :  { %v217_v59 = vpop.f32.mrf.mxu0  ;;  %v249_v60 = vpop.f32.mrf.mxu1 }
  0xe9   :  { %v592_v61 = vpack.c.bf16 %v427_v55, %v426_v53  ;;  %v612_v62 = vpack.c.bf16 %v435_v56, %v434_v54  ;;  %v425_v63 = vmul.f32 %v352_v36, %v217_v59  ;;  %v433_v0 = vmul.f32 %v392_v41, %v249_v60 }
  0xea   :  { %v669_v1 = vpop.f32.mrf.mxu0  ;;  %v677_v2 = vpop.f32.mrf.mxu1 }
  0xeb   :  { %624 = vst [vmem:[#allocation3 + $0x8] sm:$0xff] %v592_v61   ;;  %628 = vst [vmem:[#allocation3 + $0x28] sm:$0xff] %v612_v62   ;;  %v587_v3 = vpack.c.bf16 %v425_v63, %v424_v57  ;;  %v607_v4 = vpack.c.bf16 %v433_v0, %v432_v58  ;;  %v430_v11 = vmul.f32 %v669_v1, %v377_v40 }
  0xec   :  { %v230_v5 = vpop.f32.mrf.mxu0  ;;  %v262_v6 = vpop.f32.mrf.mxu1  ;;  %v438_v12 = vmul.f32 %v677_v2, %v417_v8 }
  0xed   :  { %588 = vst [vmem:[#allocation3] sm:$0xff] %v587_v3   ;;  %627 = vst [vmem:[#allocation3 + $0x20] sm:$0xff] %v607_v4   ;;  %v428_v15 = vmul.f32 %v367_v38, %v230_v5  ;;  %v436_v16 = vmul.f32 %v407_v52, %v262_v6 }
  0xee   :  { %v670_v9 = vpop.f32.mrf.mxu0  ;;  %v678_v10 = vpop.f32.mrf.mxu1 }
  0xef   :  { %v431_v13 = vmul.f32 %v670_v9, %v382_v39  ;;  %v439_v14 = vmul.f32 %v678_v10, %v422_v7 }
  0xf0   :  { %v233_v17 = vpop.f32.mrf.mxu0  ;;  %v265_v18 = vpop.f32.mrf.mxu1 }
  0xf1   :  { %v602_v19 = vpack.c.bf16 %v431_v13, %v430_v11  ;;  %v622_v20 = vpack.c.bf16 %v439_v14, %v438_v12  ;;  %v429_v21 = vmul.f32 %v372_v37, %v233_v17  ;;  %v437_v22 = vmul.f32 %v412_v51, %v265_v18 }
  0xf3   :  { %626 = vst [vmem:[#allocation3 + $0x18] sm:$0xff] %v602_v19   ;;  %630 = vst [vmem:[#allocation3 + $0x38] sm:$0xff] %v622_v20   ;;  %v597_v23 = vpack.c.bf16 %v429_v21, %v428_v15  ;;  %v617_v24 = vpack.c.bf16 %v437_v22, %v436_v16 }
  0xf5   :  { %625 = vst [vmem:[#allocation3 + $0x10] sm:$0xff] %v597_v23   ;;  %629 = vst [vmem:[#allocation3 + $0x30] sm:$0xff] %v617_v24  }
  0xf6   :  { %728 = shalt.err (!%p725_p4)
}
  0xf7   :  { %s741_s22 = smov 64   ;;  %s742_s1 = smov 4  }
  0xf8   :  { %531 = dma.vmem_to_hbm [thread:$0]  %s526_s2, 1024, %s865_s3, [#allocation4], %s741_s22, %s741_s22, %s742_s1  }
  0xf9   :  { %737 = dma.done.wait [#allocation4], 1024  }
  0xfa   :  { %738 = vsyncadd [#allocation4], 4294966272 }
  0xfb   :  { %535 = vsyncpa [#allocation4], 1 }

</bundles_post_ra>
